<compile_context>
chip_gen: v7x
topology: tpu7x:2x2x1
jax: 0.10.0
libtpu: 0.0.40
codegen_flags: <defaults>
</compile_context>

<pallas_src>
import functools

import jax
import jax.numpy as jnp
from jax.experimental import pallas as pl
from jax.experimental.pallas import tpu as pltpu


def _round_up(n: int, m: int) -> int:
    return ((n + m - 1) // m) * m


def _pad_to(a, shape):
    pads = [(0, t - s) for s, t in zip(a.shape, shape)]
    if all(p == (0, 0) for p in pads):
        return a
    return jnp.pad(a, pads)


def _decoder_kernel(num_layers, x_ref, *refs):
    """Chain of (matmul + bias) layers with a single final ReLU, all in VMEM.

    refs = (w_0..w_{L-1}, b_0..b_{L-1}, out)
    Matmuls run in the weights' dtype (bf16) with f32 MXU accumulation;
    bias-add / ReLU stay in f32.
    """
    w_refs = refs[:num_layers]
    b_refs = refs[num_layers:2 * num_layers]
    out_ref = refs[2 * num_layers]

    h = x_ref[...]                       # (bt, K0_pad), compute dtype (bf16)
    for li in range(num_layers):
        acc = jnp.dot(h, w_refs[li][...], preferred_element_type=jnp.float32)
        acc = acc + b_refs[li][...]      # f32 bias broadcast over rows
        if li + 1 < num_layers:
            h = acc.astype(w_refs[li + 1].dtype)   # back to bf16 for next MXU pass
        else:
            # Final (and only) ReLU of the module.
            out_ref[...] = jnp.maximum(acc, 0.0).astype(out_ref.dtype)


def decoder_forward(x, weights, biases, *, batch_tile=256,
                    compute_dtype=jnp.bfloat16, lane_multiple=128):
    """Run the Decoder forward pass as a single Pallas kernel.

    x:       (B, hidden_dim) float32
    weights: list of (in_i, out_i) float32 arrays, stored (in, out)
             (equivalent to PyTorch W.T, so the kernel computes h @ W + b)
    biases:  list of (out_i,) or (1, out_i) float32 arrays
    returns: (B, input_dim) float32
    """
    num_layers = len(weights)
    B, in_dim = x.shape
    assert in_dim == weights[0].shape[0]
    out_dim = weights[-1].shape[1]

    # ---- wrapper-side layout plumbing (no compute hoisted into kernel) ----
    # Batch tile: as large as requested but never bigger than the (rounded)
    # batch; always a multiple of 8 (sublane granularity).
    bt = _round_up(max(8, min(batch_tile, _round_up(B, 8))), 8)
    Bp = _round_up(B, bt)

    # Pad every feature dim to the 128-lane boundary: MXU-aligned K/N and
    # lane-dense (unmasked) output stores. Zero padding is mathematically
    # exact for Linear layers and ReLU.
    dims = [w.shape[0] for w in weights] + [out_dim]
    dims_p = [_round_up(d, lane_multiple) for d in dims]

    xp = _pad_to(x, (Bp, dims_p[0])).astype(compute_dtype)
    wps, bps = [], []
    for li, (w, b) in enumerate(zip(weights, biases)):
        wps.append(_pad_to(w, (dims_p[li], dims_p[li + 1])).astype(compute_dtype))
        bps.append(_pad_to(jnp.reshape(b, (1, -1)),
                           (1, dims_p[li + 1])).astype(jnp.float32))

    kernel = functools.partial(_decoder_kernel, num_layers)

    in_specs = [pl.BlockSpec((bt, dims_p[0]), lambda i: (i, 0))]
    # Weights / biases: full padded arrays, constant block index -> DMA'd once
    # and VMEM-resident across all batch tiles.
    for wp in wps:
        in_specs.append(pl.BlockSpec(wp.shape, lambda i: (0, 0)))
    for bp in bps:
        in_specs.append(pl.BlockSpec(bp.shape, lambda i: (0, 0)))
    out_specs = pl.BlockSpec((bt, dims_p[-1]), lambda i: (i, 0))

    # Explicit VMEM budget: double-buffered x/out tiles + resident weights
    # (BlockSpec double-buffers them too) + live f32 intermediates. Capped at
    # 64 MiB so the same config is valid on v7x's smaller physical VMEM.
    cbytes = jnp.dtype(compute_dtype).itemsize
    vmem_needed = 2 * bt * dims_p[0] * cbytes + 2 * bt * dims_p[-1] * 4
    vmem_needed += sum(2 * (wp.size * cbytes + bp.size * 4)
                       for wp, bp in zip(wps, bps))
    vmem_needed += 2 * bt * max(dims_p) * 4
    vmem_limit = int(min(max(32 * 1024 * 1024, 2 * vmem_needed),
                         64 * 1024 * 1024))

    out_p = pl.pallas_call(
        kernel,
        out_shape=jax.ShapeDtypeStruct((Bp, dims_p[-1]), jnp.float32),
        grid_spec=pltpu.PrefetchScalarGridSpec(
            num_scalar_prefetch=0,
            grid=(Bp // bt,),
            in_specs=in_specs,
            out_specs=out_specs,
        ),
        compiler_params=pltpu.CompilerParams(
            dimension_semantics=("parallel",),   # batch tiles shard across TCs
            vmem_limit_bytes=vmem_limit,
        ),
    )(xp, *wps, *bps)

    # Strip batch and lane padding (pure slice in the wrapper).
    return out_p[:B, :out_dim].astype(x.dtype)


def init_decoder_params(key, input_dim, hidden_dim, hidden_layers):
    """Parameter init mirroring the module's layer sizes.

    layers = [hidden_dim]*hidden_layers + [input_dim]
    -> hidden_layers Linear layers total.
    """
    layer_sizes = [hidden_dim] * hidden_layers + [input_dim]
    weights, biases = [], []
    for i in range(len(layer_sizes) - 1):
        fan_in, fan_out = layer_sizes[i], layer_sizes[i + 1]
        key, kw, kb = jax.random.split(key, 3)
        bound = 1.0 / (fan_in ** 0.5)
        # Stored as (in, out): equivalent to PyTorch's W.T
        w = jax.random.uniform(kw, (fan_in, fan_out), jnp.float32, -bound, bound)
        b = jax.random.uniform(kb, (1, fan_out), jnp.float32, -bound, bound)
        weights.append(w)
        biases.append(b)
    return weights, biases


def decoder_reference(x, weights, biases, compute_dtype=jnp.bfloat16):
    """Pure-JAX reference applying the same bf16-matmul / f32-accumulate casts."""
    h = x
    for w, b in zip(weights, biases):
        h = jnp.dot(h.astype(compute_dtype), w.astype(compute_dtype),
                    preferred_element_type=jnp.float32) + jnp.reshape(b, (1, -1))
    return jnp.maximum(h, 0.0)


if __name__ == "__main__":
    # Shapes consistent with the module:
    #   Decoder(input_dim=16, hidden_dim=32, hidden_layers=3)
    #   forward input x: (batch, hidden_dim)
    # batch=384 exercises batch padding (-> 512) and gives a 2-step grid with
    # 256-row tiles (feeds both v7x TensorCores via the "parallel" axis).
    input_dim = 16
    hidden_dim = 32
    hidden_layers = 3
    batch = 384

    key = jax.random.PRNGKey(0)
    key, kx = jax.random.split(key)
    x = jax.random.normal(kx, (batch, hidden_dim), jnp.float32)

    weights, biases = init_decoder_params(key, input_dim, hidden_dim, hidden_layers)

    out = decoder_forward(x, weights, biases, batch_tile=256)
    out = jax.block_until_ready(out)

    ref = decoder_reference(x, weights, biases)
    assert out.shape == (batch, input_dim)
    assert jnp.allclose(out, ref, atol=1e-4, rtol=1e-4), "mismatch vs reference"

    print("KERNEL_OK")
</pallas_src>

<mosaic_0001>
module attributes {stable_mosaic.version = 11 : i64} {
  func.func @_decoder_kernel(%arg0: i32, %arg1: memref<256x128xbf16, #tpu.memory_space<vmem>>, %arg2: memref<128x128xbf16, #tpu.memory_space<vmem>>, %arg3: memref<128x128xbf16, #tpu.memory_space<vmem>>, %arg4: memref<128x128xbf16, #tpu.memory_space<vmem>>, %arg5: memref<1x128xf32, #tpu.memory_space<vmem>>, %arg6: memref<1x128xf32, #tpu.memory_space<vmem>>, %arg7: memref<1x128xf32, #tpu.memory_space<vmem>>, %arg8: memref<256x128xf32, #tpu.memory_space<vmem>>) attributes {dimension_semantics = [#tpu.dimension_semantics<parallel>], iteration_bounds = array<i64: 2>, scalar_prefetch = 0 : i64, scratch_operands = 0 : i64, tpu.core_type = #tpu.core_type<tc>, window_params = [{transform_indices = @transform_0, window_bounds = array<i64: 256, 128>}, {pipeline_mode = #tpu.pipeline_mode<synchronous>, transform_indices = @transform_1, window_bounds = array<i64: 128, 128>}, {pipeline_mode = #tpu.pipeline_mode<synchronous>, transform_indices = @transform_2, window_bounds = array<i64: 128, 128>}, {pipeline_mode = #tpu.pipeline_mode<synchronous>, transform_indices = @transform_3, window_bounds = array<i64: 128, 128>}, {pipeline_mode = #tpu.pipeline_mode<synchronous>, transform_indices = @transform_4, window_bounds = array<i64: 1, 128>}, {pipeline_mode = #tpu.pipeline_mode<synchronous>, transform_indices = @transform_5, window_bounds = array<i64: 1, 128>}, {pipeline_mode = #tpu.pipeline_mode<synchronous>, transform_indices = @transform_6, window_bounds = array<i64: 1, 128>}, {transform_indices = @transform_7, window_bounds = array<i64: 256, 128>}]} {
    %c0 = arith.constant 0 : index
    %c0_0 = arith.constant 0 : index
    %0 = vector.load %arg1[%c0, %c0_0] : memref<256x128xbf16, #tpu.memory_space<vmem>>, vector<256x128xbf16>
    %c0_1 = arith.constant 0 : index
    %c0_2 = arith.constant 0 : index
    %1 = vector.load %arg2[%c0_1, %c0_2] : memref<128x128xbf16, #tpu.memory_space<vmem>>, vector<128x128xbf16>
    %cst = arith.constant dense<0.000000e+00> : vector<256x128xf32>
    %2 = tpu.matmul %0, %1, %cst {dimension_numbers = #tpu.dot_dimension_numbers<[1], [0], [0], [1], [0, 0, 1, 1], [], []>} : vector<256x128xbf16>, vector<128x128xbf16>, vector<256x128xf32> -> vector<256x128xf32>
    %c0_3 = arith.constant 0 : index
    %c0_4 = arith.constant 0 : index
    %3 = vector.load %arg5[%c0_3, %c0_4] : memref<1x128xf32, #tpu.memory_space<vmem>>, vector<1x128xf32>
    %4 = vector.broadcast %3 : vector<1x128xf32> to vector<256x128xf32>
    %5 = arith.addf %2, %4 : vector<256x128xf32>
    %6 = arith.truncf %5 : vector<256x128xf32> to vector<256x128xbf16>
    %c0_5 = arith.constant 0 : index
    %c0_6 = arith.constant 0 : index
    %7 = vector.load %arg3[%c0_5, %c0_6] : memref<128x128xbf16, #tpu.memory_space<vmem>>, vector<128x128xbf16>
    %cst_7 = arith.constant dense<0.000000e+00> : vector<256x128xf32>
    %8 = tpu.matmul %6, %7, %cst_7 {dimension_numbers = #tpu.dot_dimension_numbers<[1], [0], [0], [1], [0, 0, 1, 1], [], []>} : vector<256x128xbf16>, vector<128x128xbf16>, vector<256x128xf32> -> vector<256x128xf32>
    %c0_8 = arith.constant 0 : index
    %c0_9 = arith.constant 0 : index
    %9 = vector.load %arg6[%c0_8, %c0_9] : memref<1x128xf32, #tpu.memory_space<vmem>>, vector<1x128xf32>
    %10 = vector.broadcast %9 : vector<1x128xf32> to vector<256x128xf32>
    %11 = arith.addf %8, %10 : vector<256x128xf32>
    %12 = arith.truncf %11 : vector<256x128xf32> to vector<256x128xbf16>
    %c0_10 = arith.constant 0 : index
    %c0_11 = arith.constant 0 : index
    %13 = vector.load %arg4[%c0_10, %c0_11] : memref<128x128xbf16, #tpu.memory_space<vmem>>, vector<128x128xbf16>
    %cst_12 = arith.constant dense<0.000000e+00> : vector<256x128xf32>
    %14 = tpu.matmul %12, %13, %cst_12 {dimension_numbers = #tpu.dot_dimension_numbers<[1], [0], [0], [1], [0, 0, 1, 1], [], []>} : vector<256x128xbf16>, vector<128x128xbf16>, vector<256x128xf32> -> vector<256x128xf32>
    %c0_13 = arith.constant 0 : index
    %c0_14 = arith.constant 0 : index
    %15 = vector.load %arg7[%c0_13, %c0_14] : memref<1x128xf32, #tpu.memory_space<vmem>>, vector<1x128xf32>
    %16 = vector.broadcast %15 : vector<1x128xf32> to vector<256x128xf32>
    %17 = arith.addf %14, %16 : vector<256x128xf32>
    %cst_15 = arith.constant 0.000000e+00 : f32
    %18 = vector.broadcast %cst_15 : f32 to vector<256x128xf32>
    %19 = arith.maximumf %17, %18 : vector<256x128xf32>
    %c0_16 = arith.constant 0 : index
    %c0_17 = arith.constant 0 : index
    %20 = vector.load %arg8[%c0_16, %c0_17] : memref<256x128xf32, #tpu.memory_space<vmem>>, vector<256x128xf32>
    tpu.vector_store %arg8[%c0_16, %c0_17], %19 {strides = array<i32>} : memref<256x128xf32, #tpu.memory_space<vmem>>, vector<256x128xf32>,
    return
  }
  func.func @transform_0(%arg0: i32) -> (i32, i32) {
    %c0_i32 = arith.constant 0 : i32
    %c0_i32_0 = arith.constant 0 : i32
    return %arg0, %c0_i32 : i32, i32
  }
  func.func @transform_1(%arg0: i32) -> (i32, i32) {
    %c0_i32 = arith.constant 0 : i32
    %c0_i32_0 = arith.constant 0 : i32
    %c0_i32_1 = arith.constant 0 : i32
    return %c0_i32, %c0_i32_0 : i32, i32
  }
  func.func @transform_2(%arg0: i32) -> (i32, i32) {
    %c0_i32 = arith.constant 0 : i32
    %c0_i32_0 = arith.constant 0 : i32
    %c0_i32_1 = arith.constant 0 : i32
    return %c0_i32, %c0_i32_0 : i32, i32
  }
  func.func @transform_3(%arg0: i32) -> (i32, i32) {
    %c0_i32 = arith.constant 0 : i32
    %c0_i32_0 = arith.constant 0 : i32
    %c0_i32_1 = arith.constant 0 : i32
    return %c0_i32, %c0_i32_0 : i32, i32
  }
  func.func @transform_4(%arg0: i32) -> (i32, i32) {
    %c0_i32 = arith.constant 0 : i32
    %c0_i32_0 = arith.constant 0 : i32
    %c0_i32_1 = arith.constant 0 : i32
    return %c0_i32, %c0_i32_0 : i32, i32
  }
  func.func @transform_5(%arg0: i32) -> (i32, i32) {
    %c0_i32 = arith.constant 0 : i32
    %c0_i32_0 = arith.constant 0 : i32
    %c0_i32_1 = arith.constant 0 : i32
    return %c0_i32, %c0_i32_0 : i32, i32
  }
  func.func @transform_6(%arg0: i32) -> (i32, i32) {
    %c0_i32 = arith.constant 0 : i32
    %c0_i32_0 = arith.constant 0 : i32
    %c0_i32_1 = arith.constant 0 : i32
    return %c0_i32, %c0_i32_0 : i32, i32
  }
  func.func @transform_7(%arg0: i32) -> (i32, i32) {
    %c0_i32 = arith.constant 0 : i32
    %c0_i32_0 = arith.constant 0 : i32
    return %arg0, %c0_i32 : i32, i32
  }
}

</mosaic_0001>

<bundles_post_ra>
// kernel: tpu_custom_call.1
= control target key start
LH: loop header
LB: loop body
LE: loop exit
PB: predicated region body
PF: predicated region fallthrough
CT: control target
= control target key end

     0   :  { %12 = vsyncpa [#allocation3], 0  ;;  %s2494_s0 = inlined_call_operand.hbm [shape: bf16[512,128], index: 0, kind: input, shape index: {}]   ;;  %s2495_s1 = inlined_call_operand.hbm [shape: bf16[128,128], index: 1, kind: input, shape index: {}]   ;;  %s2496_s2 = inlined_call_operand.hbm [shape: bf16[128,128], index: 2, kind: input, shape index: {}]   ;;  %s2497_s3 = inlined_call_operand.hbm [shape: bf16[128,128], index: 3, kind: input, shape index: {}]   ;;  %s2498_s4 = inlined_call_operand.vmem [shape: f32[1,128], index: 4, kind: input, shape index: {}]   ;;  %s2499_s5 = inlined_call_operand.vmem [shape: f32[1,128], index: 5, kind: input, shape index: {}]   ;;  %s2500_s6 = inlined_call_operand.vmem [shape: f32[1,128], index: 6, kind: input, shape index: {}]   ;;  %s2501_s7 = inlined_call_operand.hbm [shape: f32[512,128], index: 7, kind: output, shape index: {}]  }
   0x1   :  { %14 = vsyncpa [#allocation3 + $0x1], 0 }
   0x2   :  { %15 = vsyncpa [#allocation6], 0 }
   0x3   :  { %16 = vsyncpa [#allocation9], 0 }
   0x4   :  { %17 = vsyncpa [#allocation4], 0 }
   0x5   :  { %19 = vsyncpa [#allocation4 + $0x1], 0  ;;  %s2037_s24 = smov 0   ;;  %s2039_s25 = smov 0  }
   0x6   :  { %s2041_s26 = smov 0   ;;  %s2043_s27 = smov 0  }
   0x7 LB: > { %s2058_s28 = sadd.s32 4294967295, %s1986_s27   ;;  %s1380_s29 = sadd.s32 4294967294, %s1986_s27   ;;  %s1986_s27 = sphi %s2043_s27, %s2527_s27   ;;  %s1982_s26 = sphi %s2041_s26, %s2526_s26   ;;  %s1978_s25 = sphi %s2039_s25, %s2525_s25   ;;  %s1974_s24 = sphi %s2037_s24, %s2524_s24  }
   0x8   : > { %p45_p0 = scmp.ne.s32.totalorder %s1978_s25, %s1974_s24  ;;  %p2502_p1 = scmp.eq.s32.totalorder %s2058_s28, 0 }
   0x9   : > { %p201_p3 = scmp.eq.s32.totalorder %s1380_s29, 1  ;;  %p1381_p5 = scmp.ge.s32.totalorder %s1986_s27, 1 }
   0xa   : > { %p2067_p4 = por %p2502_p1, %p45_p0  ;;  %p208_p7 = scmp.lt.s32.totalorder %s1986_s27, 3 }
   0xb   : > { %p2072_p6 = por %p201_p3, %p45_p0  ;;  %s1988_s10 = smov [#allocation5]  }
   0xc   : > { %s2506_s30 = scalar_select %p2067_p4, 1, 0 }
   0xd   : > { %s2507_s8 = scalar_select %p2072_p6, 1, 0 }
   0xe   : > { %p2077_p8 = pnand %p1381_p5, %p208_p7  ;;  %s220_s11 = sshll.u32 %s1988_s10, 4  ;;  %s2081_s11 = int_to_ptr.vmem [resolvable:$true] %s220_s11 }
   0xf   : > { %2508 = sst [smem:[#allocation15_spill]] %s2507_s8  ;;  %s1989_s13 = smov [#allocation7]  }
  0x10   : > { %s2509_s9 = scalar_select %p2077_p8, 1, 0 }
  0x11   : > { %p1693_p9 = pneg %p2077_p8  ;;  %s233_s14 = sshll.u32 %s1989_s13, 4  ;;  %s2092_s14 = int_to_ptr.vmem [resolvable:$true] %s233_s14 }
  0x12   : > { %s1990_s15 = smov [#allocation8]   ;;  %s1798_s19 = scalar_lea.hbm %s2495_s1, 1024 }
  0x13   : > { %p2088_p11 = pnand %p1693_p9, %p2502_p1  ;;  %s2094_s16 = sshll.u32 %s1990_s15, 4  ;;  %s247_s16 = int_to_ptr.vmem [resolvable:$true] %s2094_s16 }
  0x14   : > { %p1799_p12 = scmp.ne.s32.totalorder %s2495_s1, %s1798_s19  ;;  %p1805_p5 = scmp.lt.u32.totalorder %s1798_s19, %s2495_s1 }
  0x15   : > { %p2104_p13 = pneg %p2088_p11 }
  0x17   : > { %p1801_p0 = pnand %p2104_p13, %p1799_p12 }
  0x19   : > { %p1802_p3 = pneg %p1801_p0 }
  0x1b   : > { %p1807_p7 = pnand %p1805_p5, %p1802_p3 }
  0x1d   : > { %1810 = shalt.err (!%p1807_p7)
}
  0x1e   : > { %s1811_s10 = scalar_lea.vmem %s2081_s11, 1024  ;;  %p1819_p2 = scmp.lt.s32.totalorder %s2081_s11, %s2081_s11 }
  0x1f   : > { %p1812_p9 = scmp.ne.s32.totalorder %s2081_s11, %s1811_s10  ;;  %p1820_p6 = scmp.lt.s32.totalorder %s1811_s10, %s1811_s10 }
  0x21   : > { %p1814_p10 = pnand %p1812_p9, %p2104_p13  ;;  %p1821_p12 = por %p1820_p6, %p1819_p2 }
  0x23   : > { %p1815_p1 = pneg %p1814_p10 }
  0x25   : > { %p1822_p0 = pnand %p1821_p12, %p1815_p1 }
  0x27   : > { %1825 = shalt.err (!%p1822_p0)
}
  0x28   : > { %s1991_s13 = smov 64   ;;  %s1992_s15 = smov 4  }
  0x29   : > { %1696 = dma.hbm_to_vmem [thread:$0]  (!%p2088_p11), %s2495_s1, 1024, %s2081_s11, [#allocation6], %s1991_s13, %s1991_s13, %s1992_s15  }
  0x2a   : > { %s1826_s21 = scalar_lea.hbm %s2496_s2, 1024 }
  0x2b   : > { %p1827_p1 = scmp.ne.s32.totalorder %s2496_s2, %s1826_s21  ;;  %p1833_p10 = scmp.lt.u32.totalorder %s1826_s21, %s2496_s2 }
  0x2d   : > { %p1829_p2 = pnand %p1827_p1, %p2104_p13 }
  0x2f   : > { %p1830_p6 = pneg %p1829_p2 }
  0x31   : > { %p1835_p3 = pnand %p1833_p10, %p1830_p6 }
  0x33   : > { %1838 = shalt.err (!%p1835_p3)
}
  0x34   : > { %s1839_s11 = scalar_lea.vmem %s2092_s14, 1024  ;;  %p1847_p12 = scmp.lt.s32.totalorder %s2092_s14, %s2092_s14 }
  0x35   : > { %p1840_p5 = scmp.ne.s32.totalorder %s2092_s14, %s1839_s11  ;;  %p1848_p0 = scmp.lt.s32.totalorder %s1839_s11, %s1839_s11 }
  0x37   : > { %p1842_p7 = pnand %p1840_p5, %p2104_p13  ;;  %p1849_p1 = por %p1848_p0, %p1847_p12 }
  0x39   : > { %p1843_p9 = pneg %p1842_p7 }
  0x3b   : > { %p1850_p2 = pnand %p1849_p1, %p1843_p9 }
  0x3d   : > { %1853 = shalt.err (!%p1850_p2)
}
  0x3e   : > { %1699 = dma.hbm_to_vmem [thread:$0]  (!%p2088_p11), %s2496_s2, 1024, %s2092_s14, [#allocation6], %s1991_s13, %s1991_s13, %s1992_s15  }
  0x3f   : > { %s1854_s20 = scalar_lea.hbm %s2497_s3, 1024 }
  0x40   : > { %p1855_p6 = scmp.ne.s32.totalorder %s2497_s3, %s1854_s20  ;;  %p1861_p5 = scmp.lt.u32.totalorder %s1854_s20, %s2497_s3 }
  0x42   : > { %p1857_p10 = pnand %p1855_p6, %p2104_p13 }
  0x44   : > { %p1858_p3 = pneg %p1857_p10 }
  0x46   : > { %p1863_p7 = pnand %p1861_p5, %p1858_p3 }
  0x48   : > { %1866 = shalt.err (!%p1863_p7)
}
  0x49   : > { %s1867_s11 = scalar_lea.vmem %s247_s16, 1024  ;;  %p1875_p1 = scmp.lt.s32.totalorder %s247_s16, %s247_s16 }
  0x4a   : > { %p1868_p9 = scmp.ne.s32.totalorder %s247_s16, %s1867_s11  ;;  %p1876_p2 = scmp.lt.s32.totalorder %s1867_s11, %s1867_s11 }
  0x4c   : > { %p1870_p12 = pnand %p1868_p9, %p2104_p13  ;;  %p1877_p4 = por %p1876_p2, %p1875_p1 }
  0x4e   : > { %p1871_p0 = pneg %p1870_p12 }
  0x50   : > { %p1878_p8 = pnand %p1877_p4, %p1871_p0 }
  0x52   : > { %1881 = shalt.err (!%p1878_p8)
}
  0x53   : > { %1702 = dma.hbm_to_vmem [thread:$0]  (!%p2088_p11), %s2497_s3, 1024, %s247_s16, [#allocation9], %s1991_s13, %s1991_s13, %s1992_s15  }
  0x54   : > { %s2177_s22 = sadd.s32 1, %s1986_s27   ;;  %s32_s17 = sadd.s32 1, %s1982_s26 }
  0x55   : > { %s29_s12 = ssub.s32 %s1986_s27, %s2177_s22  ;;  %p39_p8 = scmp.ne.s32.totalorder %s1982_s26, %s1978_s25 }
  0x56   : > { %p30_p4 = scmp.eq.s32.totalorder %s29_s12, 0  ;;  %p40_p13 = scmp.eq.s32.totalorder %s1986_s27, 0 }
  0x57   : > { %p1714_p6 = scmp.lt.s32.totalorder %s1986_s27, 2  ;;  %p2512_p3 = scmp.eq.s32.totalorder %s2058_s28, 1 }
  0x58   : > { %s2187_s18 = scalar_select %p30_p4, %s1982_s26, %s32_s17  }
  0x59   : > { %p41_p10 = por %p40_p13, %p39_p8  ;;  %p2191_p5 = por %p2512_p3, %p39_p8 }
  0x5a   : > { %s269_s20 = sand.u32 1, %s1982_s26   ;;  %s1443_s21 = sshll.u32 %s1986_s27, 11 }
  0x5b   : > { %s1386_s16 = sshll.u32 %s269_s20, 7  ;;  %s2200_s10 = scalar_lea.hbm %s2494_s0, %s1443_s21 }
  0x5c   : > { %s273_s11 = scalar_lea.vmem [#allocation2], %s1386_s16  ;;  %p2202_p11 = pnand %p1714_p6, %p41_p10 }
  0x5d   : > { %s280_s14 = sshll.u32 %s273_s11, 4  ;;  %s2208_s12 = scalar_lea.sflag [#allocation3], %s269_s20  ;;  %s2206_s14 = int_to_ptr.vmem [resolvable:$true] %s280_s14 }
  0x5e   : > { %s1882_s17 = scalar_lea.hbm %s2200_s10, 2048  ;;  %p1884_p9 = pneg %p2202_p11 }
  0x5f   : > { %p1883_p7 = scmp.ne.s32.totalorder %s2200_s10, %s1882_s17  ;;  %s1887_s23 = scalar_lea.hbm %s2494_s0, 4096 }
  0x60   : > { %p1888_p1 = scmp.lt.u32.totalorder %s2200_s10, %s2494_s0  ;;  %p1889_p2 = scmp.lt.u32.totalorder %s1887_s23, %s1882_s17 }
  0x61   : > { %p1885_p12 = pnand %p1884_p9, %p1883_p7  ;;  %p1891_p8 = scmp.lt.u32.totalorder %s1882_s17, %s2200_s10 }
  0x62   : > { %p1890_p4 = por %p1889_p2, %p1888_p1 }
  0x63   : > { %p1886_p0 = pneg %p1885_p12 }
  0x64   : > { %p1892_p13 = por %p1891_p8, %p1890_p4 }
  0x66   : > { %p1893_p6 = pnand %p1892_p13, %p1886_p0 }
  0x68   : > { %1896 = shalt.err (!%p1893_p6)
}
  0x69   : > { %s1897_s20 = scalar_lea.vmem %s2206_s14, 2048  ;;  %s1993_s21 = smov [#allocation2]  }
  0x6a   : > { %p1898_p10 = scmp.ne.s32.totalorder %s2206_s14, %s1897_s20  ;;  %s1902_s16 = sshll.u32 %s1993_s21, 4  ;;  %s1903_s16 = int_to_ptr.vmem [resolvable:$false] %s1902_s16 }
  0x6b   : > { %s1904_s29 = scalar_lea.vmem %s1903_s16, 4096  ;;  %p1905_p12 = scmp.lt.s32.totalorder %s2206_s14, %s1903_s16 }
  0x6c   : > { %p1900_p3 = pnand %p1898_p10, %p1884_p9  ;;  %p1906_p1 = scmp.lt.s32.totalorder %s1904_s29, %s1897_s20 }
  0x6e   : > { %p1901_p7 = pneg %p1900_p3  ;;  %p1907_p2 = por %p1906_p1, %p1905_p12 }
  0x70   : > { %p1908_p4 = pnand %p1907_p2, %p1901_p7 }
  0x72   : > { %1911 = shalt.err (!%p1908_p4)
}
  0x73   : > { %1706 = dma.hbm_to_vmem [thread:$0]  (!%p2202_p11), %s2200_s10, 2048, %s2206_s14, %s2208_s12, %s1991_s13, %s1991_s13, %s1992_s15  }
  0x74   : > { %p2515_p9 = scmp.ne.s32.totalorder %s2509_s9, 0 }
  0x75   : > { %s2242_s17 = sand.u32 (!%p2515_p9), 1, %s1978_s25   ;;  %p2516_p0 = scmp.ne.s32.totalorder (!%p2515_p9), %s2506_s30, 0 }
  0x76   : > { %292 = sbr.rel (%p2515_p9) target bundleno = 896 (0x380), region = 48  ;;  %s1390_s23 = sshll.u32 (!%p2515_p9), %s2242_s17, 7 }
  0x77   : > { %s295_s11 = scalar_lea.sflag (!%p2515_p9), [#allocation3], %s2242_s17  ;;  %s2246_s20 = scalar_lea.vmem (!%p2515_p9), [#allocation2], %s1390_s23 }
  0x7d   : > { %1957 = dma.done.wait (%p2516_p0), %s295_s11, 2048  }
  0x7e   : > { %1959 = vsyncadd (%p2516_p0), %s295_s11, 4294965248  ;;  %p2517_p11 = scmp.eq.s32.totalorder %s2058_s28, 0 }
  0x80   : > { %1961 = dma.done.wait (%p2517_p11), [#allocation6], 2048   ;;  %p2518_p8 = pmov %p2517_p11 }
  0x82   : > { %1963 = vsyncadd (%p2518_p8), [#allocation6], 4294965248  ;;  %p2519_p13 = pmov %p2518_p8 }
  0x83   : > { %p2520_p6 = pmov %p2518_p8 }
  0x84   : > { %1965 = dma.done.wait (%p2519_p13), [#allocation9], 1024  }
  0x85   : > { %1967 = vsyncadd (%p2520_p6), [#allocation9], 4294966272  ;;  %v1758_v0 = vld [vmem:[#allocation5] sm:$0xff]   ;;  %v1759_v1 = vld [vmem:[#allocation5 + $0x8] sm:$0xff]   ;;  %s1394_s8 = sshll.u32 %s2242_s17, 8  ;;  %s1444_s21 = sshll.u32 %s2058_s28, 12 }
  0x86   : > { %1517 = vmatprep.subr.bf16.mxu0 %v1758_v0  ;;  %1661 = vmatprep.subr.bf16.mxu1 %v1758_v0  ;;  %v1760_v2 = vld [vmem:[#allocation5 + $0x10] sm:$0xff]   ;;  %v1761_v3 = vld [vmem:[#allocation5 + $0x18] sm:$0xff]   ;;  %v1766_v4 = vld [vmem:[%s2246_s20] sm:$0xff]   ;;  %s2381_s12 = scalar_lea.vmem [#allocation10], %s1394_s8  ;;  %s2445_s11 = scalar_lea.hbm %s2501_s7, %s1444_s21 }
  0x87   : > { %1518 = vmatpush3.bf16.msra.mxu0 %v1758_v0  ;;  %1669 = vmatpush3.bf16.msra.mxu1 %v1758_v0  ;;  %v1762_v5 = vld [vmem:[#allocation5 + $0x20] sm:$0xff]   ;;  %v1763_v6 = vld [vmem:[#allocation5 + $0x28] sm:$0xff]   ;;  %v1764_v8 = vld [vmem:[#allocation5 + $0x30] sm:$0xff]   ;;  %s1278_s16 = sshll.u32 %s2381_s12, 4  ;;  %s1265_s28 = scalar_lea.sflag [#allocation4], %s2242_s17  ;;  %s2447_s16 = int_to_ptr.vmem [resolvable:$true] %s1278_s16 }
  0x88   : > { %1519 = vmatprep.subr.bf16.mxu0 %v1759_v1  ;;  %1662 = vmatprep.subr.bf16.mxu1 %v1759_v1  ;;  %v1774_v7 = vld [vmem:[%s2246_s20 + $0x40] sm:$0xff]   ;;  %v1765_v9 = vld [vmem:[#allocation5 + $0x38] sm:$0xff]   ;;  %v1767_v10 = vld [vmem:[%s2246_s20 + $0x8] sm:$0xff]   ;;  %s1994_s30 = smov [#allocation10]  }
  0x89   : > { %1533 = vmatprep.mubr.bf16.mxu0 %v1766_v4  ;;  %1549 = vmatprep.mubr.bf16.mxu1 %v1774_v7  ;;  %v1775_v11 = vld [vmem:[%s2246_s20 + $0x48] sm:$0xff]   ;;  %v1782_v12 = vld [vmem:[#allocation7] sm:$0xff]   ;;  %v1768_v13 = vld [vmem:[%s2246_s20 + $0x10] sm:$0xff]   ;;  %s1916_s9 = sshll.u32 %s1994_s30, 4  ;;  %s1917_s9 = int_to_ptr.vmem [resolvable:$false] %s1916_s9 }
  0x8a   : > { %v1776_v14 = vld [vmem:[%s2246_s20 + $0x50] sm:$0xff]   ;;  %v1783_v15 = vld [vmem:[#allocation7 + $0x8] sm:$0xff]   ;;  %v1769_v17 = vld [vmem:[%s2246_s20 + $0x18] sm:$0xff]   ;;  %s1918_s13 = scalar_lea.vmem %s1917_s9, 8192  ;;  %p1919_p12 = scmp.lt.s32.totalorder %s2447_s16, %s1917_s9 }
  0x8b   : > { %1520 = vmatpush3.bf16.msra.mxu0 %v1759_v1  ;;  %1670 = vmatpush3.bf16.msra.mxu1 %v1759_v1  ;;  %v1784_v16 = vld [vmem:[#allocation7 + $0x10] sm:$0xff]   ;;  %v1777_v18 = vld [vmem:[%s2246_s20 + $0x58] sm:$0xff]   ;;  %v1770_v19 = vld [vmem:[%s2246_s20 + $0x20] sm:$0xff]  }
  0x8c   : > { %1521 = vmatprep.subr.bf16.mxu0 %v1760_v2  ;;  %1663 = vmatprep.subr.bf16.mxu1 %v1760_v2  ;;  %v1778_v20 = vld [vmem:[%s2246_s20 + $0x60] sm:$0xff]   ;;  %v1785_v21 = vld [vmem:[#allocation7 + $0x18] sm:$0xff]   ;;  %v1771_v23 = vld [vmem:[%s2246_s20 + $0x28] sm:$0xff]  }
  0x8d   : > { %v1786_v22 = vld [vmem:[#allocation7 + $0x20] sm:$0xff]   ;;  %v1779_v24 = vld [vmem:[%s2246_s20 + $0x68] sm:$0xff]   ;;  %v1772_v25 = vld [vmem:[%s2246_s20 + $0x30] sm:$0xff]  }
  0x8e   : > { %v1780_v26 = vld [vmem:[%s2246_s20 + $0x70] sm:$0xff]   ;;  %v1787_v27 = vld [vmem:[#allocation7 + $0x28] sm:$0xff]   ;;  %v1773_v28 = vld [vmem:[%s2246_s20 + $0x38] sm:$0xff]  }
  0x8f   : > { %1522 = vmatpush3.bf16.msra.mxu0 %v1760_v2  ;;  %1671 = vmatpush3.bf16.msra.mxu1 %v1760_v2  ;;  %v1781_v29 = vld [vmem:[%s2246_s20 + $0x78] sm:$0xff]   ;;  %v1788_v30 = vld [vmem:[#allocation7 + $0x30] sm:$0xff]   ;;  %v1790_v32 = vld [vmem:[#allocation8] sm:$0xff]   ;;  %s1912_s20 = scalar_lea.vmem %s2447_s16, 4096 }
  0x90   : > { %1523 = vmatprep.subr.bf16.mxu0 %v1761_v3  ;;  %1664 = vmatprep.subr.bf16.mxu1 %v1761_v3  ;;  %v1789_v31 = vld [vmem:[#allocation7 + $0x38] sm:$0xff]   ;;  %v1791_v33 = vld [vmem:[#allocation8 + $0x8] sm:$0xff]   ;;  %v1792_v34 = vld [vmem:[#allocation8 + $0x10] sm:$0xff]   ;;  %p1913_p10 = scmp.ne.s32.totalorder %s2447_s16, %s1912_s20  ;;  %p1920_p1 = scmp.lt.s32.totalorder %s1918_s13, %s1912_s20 }
  0x91   : > { %v1793_v35 = vld [vmem:[#allocation8 + $0x18] sm:$0xff]   ;;  %v1794_v36 = vld [vmem:[#allocation8 + $0x20] sm:$0xff]   ;;  %v1795_v37 = vld [vmem:[#allocation8 + $0x28] sm:$0xff]  }
  0x92   : > { %v2279_v39 = vld [vmem:[%s2498_s4] ss:$0 sm:$0xff]  ;;  %p1914_p3 = pnand %p1913_p10, %p2191_p5  ;;  %p1921_p2 = por %p1920_p1, %p1919_p12 }
  0x93   : > { %1524 = vmatpush3.bf16.msra.mxu0 %v1761_v3  ;;  %1672 = vmatpush3.bf16.msra.mxu1 %v1761_v3 }
  0x94   : > { %1525 = vmatprep.subr.bf16.mxu0 %v1762_v5  ;;  %1665 = vmatprep.subr.bf16.mxu1 %v1762_v5  ;;  %p1915_p7 = pneg %p1914_p3 }
  0x96   : > { %p1922_p4 = pnand %p1921_p2, %p1915_p7 }
  0x97   : > { %1526 = vmatpush3.bf16.msra.mxu0 %v1762_v5  ;;  %1673 = vmatpush3.bf16.msra.mxu1 %v1762_v5 }
  0x98   : > { %1527 = vmatprep.subr.bf16.mxu0 %v1763_v6  ;;  %1666 = vmatprep.subr.bf16.mxu1 %v1763_v6 }
  0x9b   : > { %1528 = vmatpush3.bf16.msra.mxu0 %v1763_v6  ;;  %1674 = vmatpush3.bf16.msra.mxu1 %v1763_v6 }
  0x9c   : > { %1529 = vmatprep.subr.bf16.mxu0 %v1764_v8  ;;  %1667 = vmatprep.subr.bf16.mxu1 %v1764_v8 }
  0x9f   : > { %1530 = vmatpush3.bf16.msra.mxu0 %v1764_v8  ;;  %1675 = vmatpush3.bf16.msra.mxu1 %v1764_v8 }
  0xa0   : > { %1531 = vmatprep.subr.bf16.mxu0 %v1765_v9  ;;  %1668 = vmatprep.subr.bf16.mxu1 %v1765_v9 }
  0xa3   : > { %1532 = vmatpush3.bf16.msra.mxu0 %v1765_v9  ;;  %1676 = vmatpush3.bf16.msra.mxu1 %v1765_v9 }
  0xa4   : > { %1565 = vmatprep.subr.bf16.mxu1 %v1782_v12  ;;  %1613 = vmatprep.subr.bf16.mxu0 %v1790_v32 }
  0xa6   : > { %1534 = vmatmul.mubr.bf16.vlgmr.msra.gmra.mrb[0].mxu0 %v1767_v10  ;;  %1550 = vmatmul.mubr.bf16.vlgmr.msra.gmra.mrb[0].mxu1 %v1775_v11 }
  0xa7   : > { %1537 = vmatprep.mubr.bf16.mxu0 %v1768_v13  ;;  %1553 = vmatprep.mubr.bf16.mxu1 %v1776_v14 }
  0xa8   : > { %1566 = vmatpush3.bf16.msra.mxu1 %v1782_v12  ;;  %1614 = vmatpush3.bf16.msra.mxu0 %v1790_v32 }
  0xa9   : > { %1567 = vmatprep.subr.bf16.mxu1 %v1783_v15  ;;  %1615 = vmatprep.subr.bf16.mxu0 %v1791_v33 }
  0xac   : > { %1568 = vmatpush3.bf16.msra.mxu1 %v1783_v15  ;;  %1616 = vmatpush3.bf16.msra.mxu0 %v1791_v33 }
  0xad   : > { %1569 = vmatprep.subr.bf16.mxu1 %v1784_v16  ;;  %1617 = vmatprep.subr.bf16.mxu0 %v1792_v34 }
  0xae   : > { %1538 = vmatmul.mubr.bf16.gmra.mrb[4].mxu0 %v1769_v17  ;;  %1554 = vmatmul.mubr.bf16.gmra.mrb[4].mxu1 %v1777_v18 }
  0xaf   : > { %1541 = vmatprep.mubr.bf16.mxu0 %v1770_v19  ;;  %1557 = vmatprep.mubr.bf16.mxu1 %v1778_v20 }
  0xb0   : > { %1570 = vmatpush3.bf16.msra.mxu1 %v1784_v16  ;;  %1618 = vmatpush3.bf16.msra.mxu0 %v1792_v34 }
  0xb1   : > { %1571 = vmatprep.subr.bf16.mxu1 %v1785_v21  ;;  %1619 = vmatprep.subr.bf16.mxu0 %v1793_v35 }
  0xb4   : > { %1572 = vmatpush3.bf16.msra.mxu1 %v1785_v21  ;;  %1620 = vmatpush3.bf16.msra.mxu0 %v1793_v35 }
  0xb5   : > { %1573 = vmatprep.subr.bf16.mxu1 %v1786_v22  ;;  %1621 = vmatprep.subr.bf16.mxu0 %v1794_v36 }
  0xb6   : > { %1542 = vmatmul.mubr.bf16.gmra.mrb[8].mxu0 %v1771_v23  ;;  %1558 = vmatmul.mubr.bf16.gmra.mrb[8].mxu1 %v1779_v24 }
  0xb7   : > { %1545 = vmatprep.mubr.bf16.mxu0 %v1772_v25  ;;  %1561 = vmatprep.mubr.bf16.mxu1 %v1780_v26 }
  0xb8   : > { %1574 = vmatpush3.bf16.msra.mxu1 %v1786_v22  ;;  %1622 = vmatpush3.bf16.msra.mxu0 %v1794_v36 }
  0xb9   : > { %1575 = vmatprep.subr.bf16.mxu1 %v1787_v27  ;;  %1623 = vmatprep.subr.bf16.mxu0 %v1795_v37 }
  0xbc   : > { %1576 = vmatpush3.bf16.msra.mxu1 %v1787_v27  ;;  %1624 = vmatpush3.bf16.msra.mxu0 %v1795_v37 }
  0xbd   : > { %1577 = vmatprep.subr.bf16.mxu1 %v1788_v30 }
  0xbe   : > { %1546 = vmatmul.mubr.bf16.gmra.mrb[12].mxu0 %v1773_v28  ;;  %1562 = vmatmul.mubr.bf16.gmra.mrb[12].mxu1 %v1781_v29 }
  0xc0   : > { %1578 = vmatpush3.bf16.msra.mxu1 %v1788_v30 }
  0xc1   : > { %1579 = vmatprep.subr.bf16.mxu1 %v1789_v31 }
  0xc4   : > { %1580 = vmatpush3.bf16.msra.mxu1 %v1789_v31 }
 0x179   : > { %v1535_v38 = vpop.f32.mrb[0].mxu0  ;;  %v1551_v40 = vpop.f32.mrb[0].mxu1 }
 0x17a   : > { %v577_v41 = vpop.f32.mrb[1].mxu0  ;;  %v2282_v42 = vadd.f32 %v1551_v40, %v2279_v39  ;;  %v641_v43 = vpop.f32.mrb[1].mxu1  ;;  %v586_v47 = vadd.f32 %v1535_v38, %v2279_v39 }
 0x17b   : > { %v1536_v44 = vpop.f32.mrb[2].mxu0  ;;  %v2285_v45 = vadd.f32 %v2279_v39, %v641_v43  ;;  %v1552_v46 = vpop.f32.mrb[2].mxu1  ;;  %v578_v52 = vadd.f32 %v2279_v39, %v577_v41 }
 0x17c   : > { %v589_v48 = vadd.f32 %v1536_v44, %v2279_v39  ;;  %v580_v49 = vpop.f32.mrb[3].mxu0  ;;  %v2290_v50 = vadd.f32 %v1552_v46, %v2279_v39  ;;  %v644_v51 = vpop.f32.mrb[3].mxu1 }
 0x17d   : > { %v581_v53 = vadd.f32 %v2279_v39, %v580_v49  ;;  %v2295_v54 = vadd.f32 %v2279_v39, %v644_v51 }
 0x17e   : > { %v705_v55 = vpack.c.bf16 %v589_v48, %v586_v47  ;;  %v713_v56 = vpack.c.bf16 %v2290_v50, %v2282_v42 }
 0x17f   : > { %v704_v57 = vpack.c.bf16 %v581_v53, %v578_v52  ;;  %v712_v58 = vpack.c.bf16 %v2295_v54, %v2285_v45  ;;  %v2337_v45 = vld [vmem:[%s2499_s5] ss:$0 sm:$0xff] }
 0x181   : > { %v1539_v59 = vpop.f32.mrb[4].mxu0  ;;  %1581 = vmatprep.mubr.bf16.mxu1 %v704_v57  ;;  %v1555_v60 = vpop.f32.mrb[4].mxu1 }
 0x182   : > { %v593_v61 = vpop.f32.mrb[5].mxu0  ;;  %1582 = vmatmul.mubr.bf16.vlgmr.msra.gmra.mrb[16].mxu1 %v705_v55  ;;  %v2302_v62 = vadd.f32 %v1555_v60, %v2279_v39  ;;  %v657_v63 = vpop.f32.mrb[5].mxu1  ;;  %v602_v3 = vadd.f32 %v1539_v59, %v2279_v39 }
 0x183   : > { %v1540_v0 = vpop.f32.mrb[6].mxu0  ;;  %v658_v1 = vadd.f32 %v2279_v39, %v657_v63  ;;  %v1556_v2 = vpop.f32.mrb[6].mxu1  ;;  %v594_v8 = vadd.f32 %v2279_v39, %v593_v61 }
 0x184   : > { %v605_v4 = vadd.f32 %v1540_v0, %v2279_v39  ;;  %v596_v5 = vpop.f32.mrb[7].mxu0  ;;  %v669_v6 = vadd.f32 %v1556_v2, %v2279_v39  ;;  %v660_v7 = vpop.f32.mrb[7].mxu1 }
 0x185   : > { %v597_v9 = vadd.f32 %v2279_v39, %v596_v5  ;;  %v661_v10 = vadd.f32 %v2279_v39, %v660_v7 }
 0x186   : > { %v707_v11 = vpack.c.bf16 %v605_v4, %v602_v3  ;;  %v715_v12 = vpack.c.bf16 %v669_v6, %v2302_v62  ;;  %v1797_v62 = vld [vmem:[#allocation8 + $0x38] sm:$0xff]  }
 0x187   : > { %v706_v13 = vpack.c.bf16 %v597_v9, %v594_v8  ;;  %v714_v14 = vpack.c.bf16 %v661_v10, %v658_v1 }
 0x189   : > { %v1543_v15 = vpop.f32.mrb[8].mxu0  ;;  %1585 = vmatprep.mubr.bf16.mxu1 %v706_v13  ;;  %v1559_v16 = vpop.f32.mrb[8].mxu1 }
 0x18a   : > { %v609_v17 = vpop.f32.mrb[9].mxu0  ;;  %1586 = vmatmul.mubr.bf16.gmra.mrb[20].mxu1 %v707_v11  ;;  %v682_v18 = vadd.f32 %v1559_v16, %v2279_v39  ;;  %v673_v19 = vpop.f32.mrb[9].mxu1  ;;  %v618_v23 = vadd.f32 %v1543_v15, %v2279_v39 }
 0x18b   : > { %v1544_v20 = vpop.f32.mrb[10].mxu0  ;;  %v674_v21 = vadd.f32 %v2279_v39, %v673_v19  ;;  %v1560_v22 = vpop.f32.mrb[10].mxu1  ;;  %v610_v28 = vadd.f32 %v2279_v39, %v609_v17 }
 0x18c   : > { %v621_v24 = vadd.f32 %v1544_v20, %v2279_v39  ;;  %v612_v25 = vpop.f32.mrb[11].mxu0  ;;  %v685_v26 = vadd.f32 %v1560_v22, %v2279_v39  ;;  %v676_v27 = vpop.f32.mrb[11].mxu1 }
 0x18d   : > { %v613_v29 = vadd.f32 %v2279_v39, %v612_v25  ;;  %v677_v30 = vadd.f32 %v2279_v39, %v676_v27 }
 0x18e   : > { %v709_v31 = vpack.c.bf16 %v621_v24, %v618_v23  ;;  %v717_v32 = vpack.c.bf16 %v685_v26, %v682_v18 }
 0x18f   : > { %v708_v33 = vpack.c.bf16 %v613_v29, %v610_v28  ;;  %v716_v34 = vpack.c.bf16 %v677_v30, %v674_v21 }
 0x191   : > { %v1547_v35 = vpop.f32.mrb[12].mxu0  ;;  %1589 = vmatprep.mubr.bf16.mxu1 %v708_v33  ;;  %v1563_v36 = vpop.f32.mrb[12].mxu1 }
 0x192   : > { %v625_v37 = vpop.f32.mrb[13].mxu0  ;;  %1590 = vmatmul.mubr.bf16.gmra.mrb[24].mxu1 %v709_v31  ;;  %v698_v38 = vadd.f32 %v1563_v36, %v2279_v39  ;;  %v689_v40 = vpop.f32.mrb[13].mxu1  ;;  %v634_v46 = vadd.f32 %v1547_v35, %v2279_v39 }
 0x193   : > { %v1548_v41 = vpop.f32.mrb[14].mxu0  ;;  %v690_v43 = vadd.f32 %v2279_v39, %v689_v40  ;;  %v1564_v44 = vpop.f32.mrb[14].mxu1  ;;  %v626_v52 = vadd.f32 %v2279_v39, %v625_v37 }
 0x194   : > { %v637_v47 = vadd.f32 %v1548_v41, %v2279_v39  ;;  %v628_v48 = vpop.f32.mrb[15].mxu0  ;;  %v701_v49 = vadd.f32 %v1564_v44, %v2279_v39  ;;  %v692_v51 = vpop.f32.mrb[15].mxu1 }
 0x195   : > { %v629_v53 = vadd.f32 %v2279_v39, %v628_v48  ;;  %v693_v55 = vadd.f32 %v2279_v39, %v692_v51  ;;  %v1796_v39 = vld [vmem:[#allocation8 + $0x30] sm:$0xff]  }
 0x196   : > { %v711_v57 = vpack.c.bf16 %v637_v47, %v634_v46  ;;  %v719_v59 = vpack.c.bf16 %v701_v49, %v698_v38  ;;  %1625 = vmatprep.subr.bf16.mxu0 %v1796_v39 }
 0x197   : > { %v710_v60 = vpack.c.bf16 %v629_v53, %v626_v52  ;;  %v718_v61 = vpack.c.bf16 %v693_v55, %v690_v43  ;;  %1626 = vmatpush3.bf16.msra.mxu0 %v1796_v39 }
 0x198   : > { %1627 = vmatprep.subr.bf16.mxu0 %v1797_v62 }
 0x199   : > { %1593 = vmatprep.mubr.bf16.mxu1 %v710_v60 }
 0x19a   : > { %1594 = vmatmul.mubr.bf16.gmra.mrb[28].mxu1 %v711_v57 }
 0x19b   : > { %1597 = vmatprep.mubr.bf16.mxu1 %v712_v58  ;;  %1628 = vmatpush3.bf16.msra.mxu0 %v1797_v62 }
 0x1a2   : > { %1598 = vmatmul.mubr.bf16.gmra.mrb[32].mxu1 %v713_v56 }
 0x1a3   : > { %1601 = vmatprep.mubr.bf16.mxu1 %v714_v14 }
 0x1aa   : > { %1602 = vmatmul.mubr.bf16.gmra.mrb[36].mxu1 %v715_v12 }
 0x1ab   : > { %1605 = vmatprep.mubr.bf16.mxu1 %v716_v34 }
 0x1b2   : > { %1606 = vmatmul.mubr.bf16.gmra.mrb[40].mxu1 %v717_v32 }
 0x1b3   : > { %1609 = vmatprep.mubr.bf16.mxu1 %v718_v61 }
 0x1ba   : > { %1610 = vmatmul.mubr.bf16.gmra.mrb[44].mxu1 %v719_v59 }
 0x255   : > { %v1583_v63 = vpop.f32.mrb[16].mxu1 }
 0x256   : > { %v825_v42 = vpop.f32.mrb[17].mxu1  ;;  %v834_v54 = vadd.f32 %v1583_v63, %v2337_v45 }
 0x257   : > { %v1584_v50 = vpop.f32.mrb[18].mxu1  ;;  %v826_v0 = vadd.f32 %v2337_v45, %v825_v42 }
 0x258   : > { %v837_v56 = vadd.f32 %v1584_v50, %v2337_v45  ;;  %v828_v58 = vpop.f32.mrb[19].mxu1 }
 0x259   : > { %v829_v1 = vadd.f32 %v2337_v45, %v828_v58 }
 0x25a   : > { %v953_v2 = vpack.c.bf16 %v837_v56, %v834_v54 }
 0x25b   : > { %v952_v3 = vpack.c.bf16 %v829_v1, %v826_v0 }
 0x25d   : > { %v1587_v4 = vpop.f32.mrb[20].mxu1  ;;  %1629 = vmatprep.mubr.bf16.mxu0 %v952_v3 }
 0x25e   : > { %v841_v5 = vpop.f32.mrb[21].mxu1  ;;  %1630 = vmatmul.mubr.bf16.vlgmr.msra.gmra.mrb[16].mxu0 %v953_v2  ;;  %v850_v7 = vadd.f32 %v1587_v4, %v2337_v45 }
 0x25f   : > { %v1588_v6 = vpop.f32.mrb[22].mxu1  ;;  %v842_v10 = vadd.f32 %v2337_v45, %v841_v5 }
 0x260   : > { %v853_v8 = vadd.f32 %v1588_v6, %v2337_v45  ;;  %v844_v9 = vpop.f32.mrb[23].mxu1 }
 0x261   : > { %v845_v11 = vadd.f32 %v2337_v45, %v844_v9 }
 0x262   : > { %v955_v12 = vpack.c.bf16 %v853_v8, %v850_v7 }
 0x263   : > { %v954_v13 = vpack.c.bf16 %v845_v11, %v842_v10  ;;  %v2374_v11 = vld [vmem:[%s2500_s6] ss:$0 sm:$0xff] }
 0x265   : > { %v1591_v14 = vpop.f32.mrb[24].mxu1  ;;  %1633 = vmatprep.mubr.bf16.mxu0 %v954_v13 }
 0x266   : > { %v857_v15 = vpop.f32.mrb[25].mxu1  ;;  %1634 = vmatmul.mubr.bf16.gmra.mrb[20].mxu0 %v955_v12  ;;  %v866_v17 = vadd.f32 %v1591_v14, %v2337_v45 }
 0x267   : > { %v1592_v16 = vpop.f32.mrb[26].mxu1  ;;  %v858_v20 = vadd.f32 %v2337_v45, %v857_v15 }
 0x268   : > { %v869_v18 = vadd.f32 %v1592_v16, %v2337_v45  ;;  %v860_v19 = vpop.f32.mrb[27].mxu1 }
 0x269   : > { %v861_v21 = vadd.f32 %v2337_v45, %v860_v19 }
 0x26a   : > { %v957_v22 = vpack.c.bf16 %v869_v18, %v866_v17 }
 0x26b   : > { %v956_v23 = vpack.c.bf16 %v861_v21, %v858_v20 }
 0x26d   : > { %v1595_v24 = vpop.f32.mrb[28].mxu1  ;;  %1637 = vmatprep.mubr.bf16.mxu0 %v956_v23 }
 0x26e   : > { %v873_v25 = vpop.f32.mrb[29].mxu1  ;;  %1638 = vmatmul.mubr.bf16.gmra.mrb[24].mxu0 %v957_v22  ;;  %v882_v27 = vadd.f32 %v1595_v24, %v2337_v45 }
 0x26f   : > { %v1596_v26 = vpop.f32.mrb[30].mxu1  ;;  %v874_v30 = vadd.f32 %v2337_v45, %v873_v25 }
 0x270   : > { %v885_v28 = vadd.f32 %v1596_v26, %v2337_v45  ;;  %v876_v29 = vpop.f32.mrb[31].mxu1 }
 0x271   : > { %v877_v31 = vadd.f32 %v2337_v45, %v876_v29 }
 0x272   : > { %v959_v32 = vpack.c.bf16 %v885_v28, %v882_v27 }
 0x273   : > { %v958_v33 = vpack.c.bf16 %v877_v31, %v874_v30 }
 0x275   : > { %v1599_v34 = vpop.f32.mrb[32].mxu1  ;;  %1641 = vmatprep.mubr.bf16.mxu0 %v958_v33 }
 0x276   : > { %v889_v35 = vpop.f32.mrb[33].mxu1  ;;  %1642 = vmatmul.mubr.bf16.gmra.mrb[28].mxu0 %v959_v32  ;;  %v898_v37 = vadd.f32 %v1599_v34, %v2337_v45 }
 0x277   : > { %v1600_v36 = vpop.f32.mrb[34].mxu1  ;;  %v890_v41 = vadd.f32 %v2337_v45, %v889_v35 }
 0x278   : > { %v901_v38 = vadd.f32 %v1600_v36, %v2337_v45  ;;  %v892_v40 = vpop.f32.mrb[35].mxu1 }
 0x279   : > { %v893_v43 = vadd.f32 %v2337_v45, %v892_v40 }
 0x27a   : > { %v961_v44 = vpack.c.bf16 %v901_v38, %v898_v37 }
 0x27b   : > { %v960_v46 = vpack.c.bf16 %v893_v43, %v890_v41 }
 0x27d   : > { %v1603_v47 = vpop.f32.mrb[36].mxu1  ;;  %1645 = vmatprep.mubr.bf16.mxu0 %v960_v46 }
 0x27e   : > { %v905_v48 = vpop.f32.mrb[37].mxu1  ;;  %1646 = vmatmul.mubr.bf16.gmra.mrb[32].mxu0 %v961_v44  ;;  %v914_v51 = vadd.f32 %v1603_v47, %v2337_v45 }
 0x27f   : > { %v1604_v49 = vpop.f32.mrb[38].mxu1  ;;  %v906_v55 = vadd.f32 %v2337_v45, %v905_v48 }
 0x280   : > { %v917_v52 = vadd.f32 %v1604_v49, %v2337_v45  ;;  %v908_v53 = vpop.f32.mrb[39].mxu1 }
 0x281   : > { %v909_v57 = vadd.f32 %v2337_v45, %v908_v53 }
 0x282   : > { %v963_v59 = vpack.c.bf16 %v917_v52, %v914_v51 }
 0x283   : > { %v962_v60 = vpack.c.bf16 %v909_v57, %v906_v55 }
 0x285   : > { %v1607_v61 = vpop.f32.mrb[40].mxu1  ;;  %1649 = vmatprep.mubr.bf16.mxu0 %v962_v60 }
 0x286   : > { %v921_v39 = vpop.f32.mrb[41].mxu1  ;;  %1650 = vmatmul.mubr.bf16.gmra.mrb[36].mxu0 %v963_v59  ;;  %v930_v63 = vadd.f32 %v1607_v61, %v2337_v45 }
 0x287   : > { %v1608_v62 = vpop.f32.mrb[42].mxu1  ;;  %v922_v54 = vadd.f32 %v2337_v45, %v921_v39 }
 0x288   : > { %v933_v42 = vadd.f32 %v1608_v62, %v2337_v45  ;;  %v924_v50 = vpop.f32.mrb[43].mxu1 }
 0x289   : > { %v925_v56 = vadd.f32 %v2337_v45, %v924_v50 }
 0x28a   : > { %v965_v58 = vpack.c.bf16 %v933_v42, %v930_v63 }
 0x28b   : > { %v964_v0 = vpack.c.bf16 %v925_v56, %v922_v54 }
 0x28d   : > { %v1611_v1 = vpop.f32.mrb[44].mxu1  ;;  %1653 = vmatprep.mubr.bf16.mxu0 %v964_v0 }
 0x28e   : > { %v937_v2 = vpop.f32.mrb[45].mxu1  ;;  %1654 = vmatmul.mubr.bf16.gmra.mrb[40].mxu0 %v965_v58  ;;  %v946_v4 = vadd.f32 %v1611_v1, %v2337_v45 }
 0x28f   : > { %v1612_v3 = vpop.f32.mrb[46].mxu1  ;;  %v938_v7 = vadd.f32 %v2337_v45, %v937_v2 }
 0x290   : > { %v949_v5 = vadd.f32 %v1612_v3, %v2337_v45  ;;  %v940_v6 = vpop.f32.mrb[47].mxu1 }
 0x291   : > { %v941_v8 = vadd.f32 %v2337_v45, %v940_v6 }
 0x292   : > { %v967_v9 = vpack.c.bf16 %v949_v5, %v946_v4 }
 0x293   : > { %v966_v10 = vpack.c.bf16 %v941_v8, %v938_v7 }
 0x295   : > { %1657 = vmatprep.mubr.bf16.mxu0 %v966_v10 }
 0x296   : > { %1658 = vmatmul.mubr.bf16.gmra.mrb[44].mxu0 %v967_v9 }
 0x331   : > { %v1631_v12 = vpop.f32.mrb[16].mxu0 }
 0x332   : > { %v1082_v13 = vadd.f32 %v1631_v12, %v2374_v11  ;;  %v1073_v14 = vpop.f32.mrb[17].mxu0 }
 0x333   : > { %v1074_v15 = vadd.f32 %v2374_v11, %v1073_v14  ;;  %v1632_v16 = vpop.f32.mrb[18].mxu0 }
 0x334   : > { %v1202_v17 = vmax.f32 %v1082_v13, 0.0  ;;  %v1085_v45 = vadd.f32 %v1632_v16, %v2374_v11  ;;  %v1076_v18 = vpop.f32.mrb[19].mxu0 }
 0x335   : > { %v1200_v19 = vmax.f32 %v1074_v15, 0.0  ;;  %v1077_v20 = vadd.f32 %v2374_v11, %v1076_v18 }
 0x336   : > { %1234 = vst [vmem:[%s2381_s12 + $0x10] sm:$0xff] %v1202_v17  ;;  %v1203_v21 = vmax.f32 %v1085_v45, 0.0 }
 0x337   : > { %1232 = vst [vmem:[%s2381_s12] sm:$0xff] %v1200_v19  ;;  %v1201_v22 = vmax.f32 %v1077_v20, 0.0 }
 0x338   : > { %1235 = vst [vmem:[%s2381_s12 + $0x18] sm:$0xff] %v1203_v21 }
 0x339   : > { %1233 = vst [vmem:[%s2381_s12 + $0x8] sm:$0xff] %v1201_v22  ;;  %v1635_v23 = vpop.f32.mrb[20].mxu0 }
 0x33a   : > { %v1098_v24 = vadd.f32 %v1635_v23, %v2374_v11  ;;  %v1089_v25 = vpop.f32.mrb[21].mxu0 }
 0x33b   : > { %v1090_v26 = vadd.f32 %v2374_v11, %v1089_v25  ;;  %v1636_v27 = vpop.f32.mrb[22].mxu0 }
 0x33c   : > { %v1206_v28 = vmax.f32 %v1098_v24, 0.0  ;;  %v1101_v29 = vadd.f32 %v1636_v27, %v2374_v11  ;;  %v1092_v30 = vpop.f32.mrb[23].mxu0 }
 0x33d   : > { %v1204_v31 = vmax.f32 %v1090_v26, 0.0  ;;  %v1093_v32 = vadd.f32 %v2374_v11, %v1092_v30 }
 0x33e   : > { %1238 = vst [vmem:[%s2381_s12 + $0x30] sm:$0xff] %v1206_v28  ;;  %v1207_v33 = vmax.f32 %v1101_v29, 0.0 }
 0x33f   : > { %1236 = vst [vmem:[%s2381_s12 + $0x20] sm:$0xff] %v1204_v31  ;;  %v1205_v34 = vmax.f32 %v1093_v32, 0.0 }
 0x340   : > { %1239 = vst [vmem:[%s2381_s12 + $0x38] sm:$0xff] %v1207_v33 }
 0x341   : > { %1237 = vst [vmem:[%s2381_s12 + $0x28] sm:$0xff] %v1205_v34  ;;  %v1639_v35 = vpop.f32.mrb[24].mxu0 }
 0x342   : > { %v1114_v36 = vadd.f32 %v1639_v35, %v2374_v11  ;;  %v1105_v37 = vpop.f32.mrb[25].mxu0 }
 0x343   : > { %v1106_v38 = vadd.f32 %v2374_v11, %v1105_v37  ;;  %v1640_v40 = vpop.f32.mrb[26].mxu0 }
 0x344   : > { %v1210_v41 = vmax.f32 %v1114_v36, 0.0  ;;  %v1117_v43 = vadd.f32 %v1640_v40, %v2374_v11  ;;  %v1108_v44 = vpop.f32.mrb[27].mxu0 }
 0x345   : > { %v1208_v46 = vmax.f32 %v1106_v38, 0.0  ;;  %v1109_v47 = vadd.f32 %v2374_v11, %v1108_v44 }
 0x346   : > { %1242 = vst [vmem:[%s2381_s12 + $0x50] sm:$0xff] %v1210_v41  ;;  %v1211_v48 = vmax.f32 %v1117_v43, 0.0 }
 0x347   : > { %1240 = vst [vmem:[%s2381_s12 + $0x40] sm:$0xff] %v1208_v46  ;;  %v1209_v49 = vmax.f32 %v1109_v47, 0.0 }
 0x348   : > { %1243 = vst [vmem:[%s2381_s12 + $0x58] sm:$0xff] %v1211_v48 }
 0x349   : > { %1241 = vst [vmem:[%s2381_s12 + $0x48] sm:$0xff] %v1209_v49  ;;  %v1643_v51 = vpop.f32.mrb[28].mxu0 }
 0x34a   : > { %v1130_v52 = vadd.f32 %v1643_v51, %v2374_v11  ;;  %v1121_v53 = vpop.f32.mrb[29].mxu0 }
 0x34b   : > { %v1122_v55 = vadd.f32 %v2374_v11, %v1121_v53  ;;  %v1644_v57 = vpop.f32.mrb[30].mxu0 }
 0x34c   : > { %v1214_v59 = vmax.f32 %v1130_v52, 0.0  ;;  %v1133_v60 = vadd.f32 %v1644_v57, %v2374_v11  ;;  %v1124_v61 = vpop.f32.mrb[31].mxu0 }
 0x34d   : > { %v1212_v39 = vmax.f32 %v1122_v55, 0.0  ;;  %v1125_v62 = vadd.f32 %v2374_v11, %v1124_v61 }
 0x34e   : > { %1246 = vst [vmem:[%s2381_s12 + $0x70] sm:$0xff] %v1214_v59  ;;  %v1215_v63 = vmax.f32 %v1133_v60, 0.0 }
 0x34f   : > { %1244 = vst [vmem:[%s2381_s12 + $0x60] sm:$0xff] %v1212_v39  ;;  %v1213_v42 = vmax.f32 %v1125_v62, 0.0 }
 0x350   : > { %1247 = vst [vmem:[%s2381_s12 + $0x78] sm:$0xff] %v1215_v63 }
 0x351   : > { %1245 = vst [vmem:[%s2381_s12 + $0x68] sm:$0xff] %v1213_v42  ;;  %v1647_v50 = vpop.f32.mrb[32].mxu0 }
 0x352   : > { %v1146_v54 = vadd.f32 %v1647_v50, %v2374_v11  ;;  %v1137_v56 = vpop.f32.mrb[33].mxu0 }
 0x353   : > { %v1138_v58 = vadd.f32 %v2374_v11, %v1137_v56  ;;  %v1648_v0 = vpop.f32.mrb[34].mxu0 }
 0x354   : > { %v1218_v1 = vmax.f32 %v1146_v54, 0.0  ;;  %v1149_v2 = vadd.f32 %v1648_v0, %v2374_v11  ;;  %v1140_v3 = vpop.f32.mrb[35].mxu0 }
 0x355   : > { %v1216_v4 = vmax.f32 %v1138_v58, 0.0  ;;  %v1141_v5 = vadd.f32 %v2374_v11, %v1140_v3 }
 0x356   : > { %1250 = vst [vmem:[%s2381_s12 + $0x90] sm:$0xff] %v1218_v1  ;;  %v1219_v6 = vmax.f32 %v1149_v2, 0.0 }
 0x357   : > { %1248 = vst [vmem:[%s2381_s12 + $0x80] sm:$0xff] %v1216_v4  ;;  %v1217_v7 = vmax.f32 %v1141_v5, 0.0 }
 0x358   : > { %1251 = vst [vmem:[%s2381_s12 + $0x98] sm:$0xff] %v1219_v6 }
 0x359   : > { %1249 = vst [vmem:[%s2381_s12 + $0x88] sm:$0xff] %v1217_v7  ;;  %v1651_v8 = vpop.f32.mrb[36].mxu0 }
 0x35a   : > { %v1162_v9 = vadd.f32 %v1651_v8, %v2374_v11  ;;  %v1153_v10 = vpop.f32.mrb[37].mxu0 }
 0x35b   : > { %v1154_v12 = vadd.f32 %v2374_v11, %v1153_v10  ;;  %v1652_v13 = vpop.f32.mrb[38].mxu0 }
 0x35c   : > { %v1222_v14 = vmax.f32 %v1162_v9, 0.0  ;;  %v1165_v15 = vadd.f32 %v1652_v13, %v2374_v11  ;;  %v1156_v16 = vpop.f32.mrb[39].mxu0 }
 0x35d   : > { %v1220_v17 = vmax.f32 %v1154_v12, 0.0  ;;  %v1157_v45 = vadd.f32 %v2374_v11, %v1156_v16 }
 0x35e   : > { %1254 = vst [vmem:[%s2381_s12 + $0xb0] sm:$0xff] %v1222_v14  ;;  %v1223_v18 = vmax.f32 %v1165_v15, 0.0 }
 0x35f   : > { %1252 = vst [vmem:[%s2381_s12 + $0xa0] sm:$0xff] %v1220_v17  ;;  %v1221_v19 = vmax.f32 %v1157_v45, 0.0 }
 0x360   : > { %1255 = vst [vmem:[%s2381_s12 + $0xb8] sm:$0xff] %v1223_v18 }
 0x361   : > { %1253 = vst [vmem:[%s2381_s12 + $0xa8] sm:$0xff] %v1221_v19  ;;  %v1655_v20 = vpop.f32.mrb[40].mxu0 }
 0x362   : > { %v1178_v21 = vadd.f32 %v1655_v20, %v2374_v11  ;;  %v1169_v22 = vpop.f32.mrb[41].mxu0 }
 0x363   : > { %v1170_v23 = vadd.f32 %v2374_v11, %v1169_v22  ;;  %v1656_v24 = vpop.f32.mrb[42].mxu0 }
 0x364   : > { %v1226_v25 = vmax.f32 %v1178_v21, 0.0  ;;  %v1181_v26 = vadd.f32 %v1656_v24, %v2374_v11  ;;  %v1172_v27 = vpop.f32.mrb[43].mxu0 }
 0x365   : > { %v1224_v28 = vmax.f32 %v1170_v23, 0.0  ;;  %v1173_v29 = vadd.f32 %v2374_v11, %v1172_v27 }
 0x366   : > { %1258 = vst [vmem:[%s2381_s12 + $0xd0] sm:$0xff] %v1226_v25  ;;  %v1227_v30 = vmax.f32 %v1181_v26, 0.0 }
 0x367   : > { %1256 = vst [vmem:[%s2381_s12 + $0xc0] sm:$0xff] %v1224_v28  ;;  %v1225_v31 = vmax.f32 %v1173_v29, 0.0 }
 0x368   : > { %1259 = vst [vmem:[%s2381_s12 + $0xd8] sm:$0xff] %v1227_v30 }
 0x369   : > { %1257 = vst [vmem:[%s2381_s12 + $0xc8] sm:$0xff] %v1225_v31  ;;  %v1659_v32 = vpop.f32.mrb[44].mxu0 }
 0x36a   : > { %v1194_v33 = vadd.f32 %v1659_v32, %v2374_v11  ;;  %v1185_v34 = vpop.f32.mrb[45].mxu0 }
 0x36b   : > { %v1186_v35 = vadd.f32 %v2374_v11, %v1185_v34  ;;  %v1660_v36 = vpop.f32.mrb[46].mxu0 }
 0x36c   : > { %v1230_v37 = vmax.f32 %v1194_v33, 0.0  ;;  %v1197_v38 = vadd.f32 %v1660_v36, %v2374_v11  ;;  %v1188_v40 = vpop.f32.mrb[47].mxu0 }
 0x36d   : > { %v1228_v41 = vmax.f32 %v1186_v35, 0.0  ;;  %v1189_v43 = vadd.f32 %v2374_v11, %v1188_v40 }
 0x36e   : > { %1262 = vst [vmem:[%s2381_s12 + $0xf0] sm:$0xff] %v1230_v37  ;;  %v1231_v44 = vmax.f32 %v1197_v38, 0.0 }
 0x36f   : > { %1260 = vst [vmem:[%s2381_s12 + $0xe0] sm:$0xff] %v1228_v41  ;;  %v1229_v46 = vmax.f32 %v1189_v43, 0.0 }
 0x370   : > { %1263 = vst [vmem:[%s2381_s12 + $0xf8] sm:$0xff] %v1231_v44 }
 0x371   : > { %1261 = vst [vmem:[%s2381_s12 + $0xe8] sm:$0xff] %v1229_v46 }
 0x372   : > { %1925 = shalt.err (!%p1922_p4)
}
 0x373   : > { %s1926_s15 = scalar_lea.hbm %s2445_s11, 4096  ;;  %s1930_s8 = scalar_lea.hbm %s2501_s7, 8192 }
 0x374   : > { %p1927_p9 = scmp.ne.s32.totalorder %s2445_s11, %s1926_s15  ;;  %p1931_p8 = scmp.lt.u32.totalorder %s2445_s11, %s2501_s7 }
 0x375   : > { %p1932_p13 = scmp.lt.u32.totalorder %s1930_s8, %s1926_s15  ;;  %p1934_p10 = scmp.lt.u32.totalorder %s1926_s15, %s2445_s11 }
 0x376   : > { %p1928_p0 = pnand %p1927_p9, %p2191_p5 }
 0x377   : > { %p1933_p6 = por %p1932_p13, %p1931_p8 }
 0x378   : > { %p1929_p11 = pneg %p1928_p0 }
 0x379   : > { %p1935_p3 = por %p1934_p10, %p1933_p6 }
 0x37b   : > { %p1936_p7 = pnand %p1935_p3, %p1929_p11 }
 0x37d   : > { %1939 = shalt.err (!%p1936_p7)
}
 0x37e   : > { %s1995_s29 = smov 128   ;;  %s1996_s23 = smov 8  }
 0x37f   : > { %1691 = dma.vmem_to_hbm [thread:$0]  (%p2191_p5), %s2447_s16, 4096, %s2445_s11, %s1265_s28, %s1995_s29, %s1995_s29, %s1996_s23  }
 0x380 PF: > { %s2521_s20 = sld [smem:[#allocation15_spill]]  ;;  %s1293_s30 = sand.u32 1, %s1974_s24  }
 0x381   : > { %p2523_p1 = scmp.ge.s32.totalorder %s1986_s27, 2  ;;  %s1294_s9 = scalar_lea.sflag [#allocation4], %s1293_s30 }
 0x386   : > { %p2522_p12 = scmp.ne.s32.totalorder %s2521_s20, 0 }
 0x388   : > { %p1708_p2 = pnand %p2523_p1, %p2522_p12 }
 0x38a   : > { %1969 = dma.done.wait (!%p1708_p2), %s1294_s9, 4096  }
 0x38b   : > { %1971 = vsyncadd (!%p1708_p2), %s1294_s9, 4294963200  ;;  %p22_p4 = scmp.ge.s32.totalorder %s2177_s22, 4   ;;  %s2524_s24 = smov %s1978_s25 }
 0x38c   : > { %s2525_s25 = smov %s1982_s26  ;;  %s2526_s26 = smov %s2187_s18 }
 0x38d   : > { %s2527_s27 = smov %s2177_s22  ;;  %24 = sbr.rel (!%p22_p4) target bundleno = 7 (0x7), region = 105 }
 0x394   :  { %1299 = vsyncpa [#allocation3], 1 }
 0x395   :  { %1301 = vsyncpa [#allocation3 + $0x1], 1 }
 0x396   :  { %1302 = vsyncpa [#allocation6], 1 }
 0x397   :  { %1303 = vsyncpa [#allocation9], 1 }
 0x398   :  { %1304 = vsyncpa [#allocation4], 1 }
 0x399   :  { %1306 = vsyncpa [#allocation4 + $0x1], 1 }

</bundles_post_ra>
